<compile_context>
chip_gen: v7x
topology: tpu7x:2x2x1
jax: 0.10.0
libtpu: 0.0.40
codegen_flags: <defaults>
</compile_context>

<pallas_src>
import jax
import jax.numpy as jnp
from jax.experimental import pallas as pl
from jax.experimental.pallas import tpu as pltpu

INPUT_DIM = 1
OUTPUT_DIM = 1

LANES = 128                    # vreg lane width
MAX_TILE_ROWS = 2048           # 2048 x 128 x 4B = 1 MiB per f32 block
SMALL_BATCH_THRESHOLD = 1 << 16  # below this, plain XLA is strictly faster


def linear_kernel(w_ref, b_ref, x_ref, o_ref):
    # w_ref, b_ref: (1,) scalars in SMEM
    # x_ref, o_ref: (tile_rows, 128) lane-dense slab of the batch in VMEM
    w = w_ref[0]
    b = b_ref[0]
    o_ref[...] = (x_ref[...] * w + b).astype(o_ref.dtype)


def linear_forward(x, weight, bias, *, force_pallas=False):
    """x: (B, 1); weight: (1, 1); bias: (1,). Returns (B, 1) = x @ W^T + b."""
    B, in_dim = x.shape
    out_dim = weight.shape[0]
    assert in_dim == INPUT_DIM and out_dim == OUTPUT_DIM

    w_flat = weight.reshape(-1).astype(x.dtype)   # (1,)
    b_flat = bias.reshape(-1).astype(x.dtype)     # (1,)

    # ---- Small-batch fast path: one fused XLA elementwise pass -----------------
    if not force_pallas and B < SMALL_BATCH_THRESHOLD:
        return x * w_flat[0] + b_flat[0]

    # ---- Lane-dense repack: (B, 1) -> (rows, 128) slab --------------------------
    dtype = x.dtype
    itemsize = jnp.dtype(dtype).itemsize
    sub = max(8, 32 // itemsize)         # sublane multiple: f32->8, bf16->16, int8->32

    rows = pl.cdiv(B, LANES)
    if B % LANES == 0:
        # Contiguous reshape: free bitcast, no extra HBM pass.
        x2 = x.reshape(rows, LANES)
        padded = False
    else:
        # Rare path: pad only the flat tail to the next lane multiple; the pad is
        # allowed to fuse into the pallas_call's input DMA (allow_input_fusion).
        x2 = jnp.pad(x.reshape(-1), (0, rows * LANES - B)).reshape(rows, LANES)
        padded = True

    # ---- Tile sizing: ~1 MiB blocks, but keep >= 2 grid steps when possible -----
    desired_tiles = max(2, pl.cdiv(rows, MAX_TILE_ROWS))
    tile_rows = pl.cdiv(pl.cdiv(rows, desired_tiles), sub) * sub
    tile_rows = max(sub, min(tile_rows, MAX_TILE_ROWS))
    grid = (pl.cdiv(rows, tile_rows),)   # ragged last block is masked by Pallas

    out2 = pl.pallas_call(
        linear_kernel,
        out_shape=jax.ShapeDtypeStruct((rows, LANES), dtype),
        grid_spec=pltpu.PrefetchScalarGridSpec(
            num_scalar_prefetch=0,
            grid=grid,
            in_specs=[
                pl.BlockSpec(memory_space=pltpu.MemorySpace.SMEM),   # weight (1,)
                pl.BlockSpec(memory_space=pltpu.MemorySpace.SMEM),   # bias   (1,)
                pl.BlockSpec((tile_rows, LANES), lambda i: (i, 0)),  # x slab
            ],
            out_specs=pl.BlockSpec((tile_rows, LANES), lambda i: (i, 0)),
        ),
        compiler_params=pltpu.CompilerParams(
            dimension_semantics=("parallel",),          # mem-bound; shard across TCs
            allow_input_fusion=[False, False, True],    # let the tail-pad fuse in
        ),
    )(w_flat, b_flat, x2)

    if padded:
        return out2.reshape(-1)[:B].reshape(B, out_dim)
    return out2.reshape(B, out_dim)


if __name__ == "__main__":
    key = jax.random.PRNGKey(0)
    k_x, k_w, k_b, k_x2, k_x3 = jax.random.split(key, 5)

    # Deterministic params (mimicking nn.Linear uniform(-1/sqrt(fan_in), +1/sqrt(fan_in)))
    bound = 1.0 / (INPUT_DIM ** 0.5)
    weight = jax.random.uniform(k_w, (OUTPUT_DIM, INPUT_DIM),
                                minval=-bound, maxval=bound, dtype=jnp.float32)
    bias = jax.random.uniform(k_b, (OUTPUT_DIM,),
                              minval=-bound, maxval=bound, dtype=jnp.float32)

    def ref_fn(xx):
        return xx @ weight.T + bias

    # 1) Module-typical small batch: force the Pallas path so the kernel runs,
    #    and also check the default (XLA fast-path) result.
    batch = 8
    x = jax.random.normal(k_x, (batch, INPUT_DIM), dtype=jnp.float32)
    out = jax.block_until_ready(linear_forward(x, weight, bias, force_pallas=True))
    assert out.shape == (batch, OUTPUT_DIM)
    assert jnp.allclose(out, ref_fn(x), atol=1e-5, rtol=1e-5)
    out_fast = jax.block_until_ready(linear_forward(x, weight, bias))
    assert jnp.allclose(out_fast, ref_fn(x), atol=1e-5, rtol=1e-5)

    # 2) Lane-aligned batch (B % 128 == 0): no-pad / no-slice kernel path.
    batch2 = 256
    xb = jax.random.normal(k_x2, (batch2, INPUT_DIM), dtype=jnp.float32)
    out2 = jax.block_until_ready(linear_forward(xb, weight, bias, force_pallas=True))
    assert out2.shape == (batch2, OUTPUT_DIM)
    assert jnp.allclose(out2, ref_fn(xb), atol=1e-5, rtol=1e-5)

    # 3) Ragged batch (B % 128 != 0): padded-tail kernel path.
    batch3 = 1000
    xc = jax.random.normal(k_x3, (batch3, INPUT_DIM), dtype=jnp.float32)
    out3 = jax.block_until_ready(linear_forward(xc, weight, bias, force_pallas=True))
    assert out3.shape == (batch3, OUTPUT_DIM)
    assert jnp.allclose(out3, ref_fn(xc), atol=1e-5, rtol=1e-5)

    print("KERNEL_OK")
</pallas_src>

<mosaic_0001>
module attributes {stable_mosaic.version = 11 : i64} {
  func.func @linear_kernel(%arg0: i32, %arg1: memref<1xf32, #tpu.memory_space<smem>>, %arg2: memref<1xf32, #tpu.memory_space<smem>>, %arg3: memref<8x128xf32, #tpu.memory_space<vmem>>, %arg4: memref<8x128xf32, #tpu.memory_space<vmem>>) attributes {dimension_semantics = [#tpu.dimension_semantics<parallel>], iteration_bounds = array<i64: 1>, scalar_prefetch = 0 : i64, scratch_operands = 0 : i64, tpu.core_type = #tpu.core_type<tc>, window_params = [{transform_indices = @transform_0, window_bounds = array<i64: 1>}, {transform_indices = @transform_1, window_bounds = array<i64: 1>}, {transform_indices = @transform_2, window_bounds = array<i64: 8, 128>}, {transform_indices = @transform_3, window_bounds = array<i64: 8, 128>}]} {
    %c0 = arith.constant 0 : index
    %0 = memref.load %arg1[%c0] : memref<1xf32, #tpu.memory_space<smem>>
    %c0_0 = arith.constant 0 : index
    %1 = memref.load %arg2[%c0_0] : memref<1xf32, #tpu.memory_space<smem>>
    %c0_1 = arith.constant 0 : index
    %c0_2 = arith.constant 0 : index
    %2 = vector.load %arg3[%c0_1, %c0_2] : memref<8x128xf32, #tpu.memory_space<vmem>>, vector<8x128xf32>
    %3 = vector.broadcast %0 : f32 to vector<8x128xf32>
    %4 = arith.mulf %2, %3 : vector<8x128xf32>
    %5 = vector.broadcast %1 : f32 to vector<8x128xf32>
    %6 = arith.addf %4, %5 : vector<8x128xf32>
    %c0_3 = arith.constant 0 : index
    %c0_4 = arith.constant 0 : index
    %7 = vector.load %arg4[%c0_3, %c0_4] : memref<8x128xf32, #tpu.memory_space<vmem>>, vector<8x128xf32>
    tpu.vector_store %arg4[%c0_3, %c0_4], %6 {strides = array<i32>} : memref<8x128xf32, #tpu.memory_space<vmem>>, vector<8x128xf32>,
    return
  }
  func.func @transform_0(%arg0: i32) -> i32 {
    %c0_i32 = arith.constant 0 : i32
    %c0_i32_0 = arith.constant 0 : i32
    return %c0_i32 : i32
  }
  func.func @transform_1(%arg0: i32) -> i32 {
    %c0_i32 = arith.constant 0 : i32
    %c0_i32_0 = arith.constant 0 : i32
    return %c0_i32 : i32
  }
  func.func @transform_2(%arg0: i32) -> (i32, i32) {
    %c0_i32 = arith.constant 0 : i32
    %c0_i32_0 = arith.constant 0 : i32
    return %arg0, %c0_i32 : i32, i32
  }
  func.func @transform_3(%arg0: i32) -> (i32, i32) {
    %c0_i32 = arith.constant 0 : i32
    %c0_i32_0 = arith.constant 0 : i32
    return %arg0, %c0_i32 : i32, i32
  }
}

</mosaic_0001>

<bundles_post_ra>
// kernel: tpu_custom_call.1
= control target key start
LH: loop header
LB: loop body
LE: loop exit
PB: predicated region body
PF: predicated region fallthrough
CT: control target
= control target key end

     0   :  { %10 = vsyncpa [#allocation5], 0  ;;  %s112_s0 = inlined_call_operand.<no memory space> [shape: f32[1], index: 0, kind: input, shape index: {}]   ;;  %s113_s1 = inlined_call_operand.<no memory space> [shape: f32[1], index: 1, kind: input, shape index: {}]   ;;  %s114_s2 = inlined_call_operand.vmem [shape: f32[1,128], index: 2, kind: input, shape index: {}]   ;;  %s115_s3 = inlined_call_operand.hbm [shape: f32[1,128], index: 3, kind: output, shape index: {}]  }
   0x1   :  { %v19_v0 = vld [vmem:[%s114_s2] sm:$0xff]  ;;  %v20_v1 = vstv %s112_s0  ;;  %v22_v2 = vstv %s113_s1 }
   0x2   :  { %v21_v3 = vmul.f32 %v20_v1, %v19_v0 }
   0x4   :  { %v23_v4 = vadd.f32 %v22_v2, %v21_v3 }
   0x6   :  { %24 = vst [vmem:[#allocation4] sm:$0xff] %v23_v4 }
   0x7   :  { %29 = vsyncadd [#allocation5], 112  ;;  %s68_s18 = smov [#allocation4]  }
   0x8   :  { %s30_s19 = sshll.u32 %s68_s18, 4  ;;  %s31_s19 = int_to_ptr.vmem [resolvable:$true] %s30_s19 }
   0x9   :  { %s44_s20 = scalar_lea.vmem %s31_s19, 16  ;;  %s48_s21 = scalar_lea.vmem %s31_s19, 128 }
   0xa   :  { %p45_p0 = scmp.ne.s32.totalorder %s31_s19, %s44_s20  ;;  %p49_p1 = scmp.lt.s32.totalorder %s31_s19, %s31_s19 }
   0xb   :  { %p50_p2 = scmp.lt.s32.totalorder %s48_s21, %s44_s20 }
   0xd   :  { %p51_p3 = por %p50_p2, %p49_p1 }
   0xf   :  { %p52_p4 = pnand %p51_p3, %p45_p0 }
  0x11   :  { %55 = shalt.err (!%p52_p4)
}
  0x12   :  { %s56_s22 = scalar_lea.hbm %s115_s3, 16 }
  0x13   :  { %p57_p5 = scmp.ne.s32.totalorder %s115_s3, %s56_s22  ;;  %p60_p6 = scmp.lt.u32.totalorder %s56_s22, %s115_s3 }
  0x15   :  { %p62_p7 = pnand %p60_p6, %p57_p5 }
  0x17   :  { %65 = shalt.err (!%p62_p7)
}
  0x18   :  { %s69_s26 = smov 16   ;;  %s70_s27 = smov 1  }
  0x19   :  { %36 = dma.vmem_to_hbm [thread:$0]  %s31_s19, 16, %s115_s3, [#allocation5], %s69_s26, %s69_s26, %s70_s27  }
  0x1a   :  { %66 = dma.done.wait [#allocation5], 128  }
  0x1b   :  { %67 = vsyncadd [#allocation5], 4294967168 }
  0x1c   :  { %40 = vsyncpa [#allocation5], 1 }

</bundles_post_ra>
